<compile_context>
chip_gen: v7x
topology: tpu7x:2x2x1
jax: 0.10.0
libtpu: 0.0.40
codegen_flags: <defaults>
</compile_context>

<pallas_src>
import functools

import jax
import jax.numpy as jnp
from jax.experimental import pallas as pl
from jax.experimental.pallas import tpu as pltpu


def _ls_ce_kernel(x_ref, t_ref, o_ref, *, smoothing, num_classes, true_b, block_b):
    i = pl.program_id(0)
    x = x_ref[...]                                   # (TB, C_pad), input dtype
    t = t_ref[...]                                   # (TB, 1), int32 targets
    tb, c_pad = x.shape

    confidence = 1.0 - smoothing
    # TODO(synk): off_value divides by zero for num_classes == 1 (same as the PyTorch module).
    off_value = smoothing / (num_classes - 1)

    class_ids = jax.lax.broadcasted_iota(jnp.int32, (tb, c_pad), 1)
    class_valid = class_ids < num_classes            # mask padded class lanes

    # Numerically stable logsumexp over valid class lanes.
    neg_inf = jnp.asarray(-jnp.inf, x.dtype)
    x_m = jnp.where(class_valid, x, neg_inf)
    m = jnp.max(x_m, axis=1, keepdims=True)          # max/sub in input dtype
    shifted = (x_m - m).astype(jnp.float32)          # padded lanes -> -inf -> exp 0
    lse = jnp.log(jnp.sum(jnp.exp(shifted), axis=1, keepdims=True)) + m.astype(jnp.float32)

    xf = x.astype(jnp.float32)
    # x[target] per row via lane-select + reduce (no gather/scatter needed).
    x_t = jnp.sum(jnp.where(class_ids == t, xf, 0.0), axis=1, keepdims=True)
    # sum over true classes of x.
    sum_x = jnp.sum(jnp.where(class_valid, xf, 0.0), axis=1, keepdims=True)

    # Closed form of -(smooth_targets * log_probs).sum(dim=1):
    #   = -[(conf - off) * log_p[t] + off * sum_j log_p_j]
    row_loss = -(
        (confidence - off_value) * (x_t - lse)
        + off_value * (sum_x - num_classes * lse)
    )

    # Zero out rows beyond the true batch (batch padding).
    row_ids = i * block_b + jax.lax.broadcasted_iota(jnp.int32, (tb, 1), 0)
    o_ref[...] = jnp.where(row_ids < true_b, row_loss, 0.0)


def label_smoothing_cross_entropy(inputs, targets, *, smoothing=0.0, num_classes=10):
    """inputs: (B, C) float logits; targets: (B,) int class indices. Returns scalar f32 loss."""
    B, C = inputs.shape
    assert C == num_classes

    itemsize = jnp.dtype(inputs.dtype).itemsize
    # Lane-dense class dim: pad up to a multiple of 128.
    c_pad = max(128, ((C + 127) // 128) * 128)

    # Batch tile: keep 2x double-buffered logits tiles well under the scoped VMEM
    # default (conservative ~8 MiB budget => safe on v5e/v6e/v7x), multiple of 8.
    budget_bytes = 8 * 1024 * 1024
    tb = budget_bytes // (2 * c_pad * itemsize)
    tb = max(8, min((tb // 8) * 8, 512))
    b_rounded = ((B + 7) // 8) * 8
    tb = min(tb, b_rounded)
    b_pad = ((B + tb - 1) // tb) * tb
    num_tiles = b_pad // tb

    # Host-side padding (rows with zeros; padded class lanes with zeros, masked in-kernel).
    x_p = jnp.pad(inputs, ((0, b_pad - B), (0, c_pad - C)))
    t_p = jnp.pad(targets.astype(jnp.int32).reshape(B, 1), ((0, b_pad - B), (0, 0)))

    kernel = functools.partial(
        _ls_ce_kernel,
        smoothing=float(smoothing),
        num_classes=int(num_classes),
        true_b=int(B),
        block_b=int(tb),
    )

    cost = pl.CostEstimate(
        flops=8 * b_pad * c_pad,
        transcendentals=b_pad * c_pad,
        bytes_accessed=b_pad * c_pad * itemsize + b_pad * 4 + b_pad * 4,
    )

    row_losses = pl.pallas_call(
        kernel,
        out_shape=jax.ShapeDtypeStruct((b_pad, 1), jnp.float32),
        grid=(num_tiles,),
        in_specs=[
            pl.BlockSpec((tb, c_pad), lambda i: (i, 0)),
            pl.BlockSpec((tb, 1), lambda i: (i, 0)),
        ],
        out_specs=pl.BlockSpec((tb, 1), lambda i: (i, 0)),
        compiler_params=pltpu.CompilerParams(
            dimension_semantics=("parallel",),
        ),
        cost_estimate=cost,
    )(x_p, t_p)

    # Mean over the true batch (padded rows contribute exactly 0).
    return jnp.sum(row_losses) / jnp.float32(B)


def _reference(inputs, targets, smoothing, num_classes):
    # Pure-JAX reference mirroring the PyTorch forward exactly.
    confidence = 1.0 - smoothing
    one_hot = jax.nn.one_hot(targets, num_classes, dtype=inputs.dtype)
    smooth = one_hot * confidence + (1.0 - one_hot) * smoothing / (num_classes - 1)
    log_probs = jax.nn.log_softmax(inputs, axis=1)
    return (-smooth * log_probs).sum(axis=1).mean()


if __name__ == "__main__":
    B, NUM_CLASSES = 8, 10
    SMOOTHING = 0.1

    key = jax.random.PRNGKey(0)
    k_x, k_t = jax.random.split(key)
    inputs = jax.random.normal(k_x, (B, NUM_CLASSES), dtype=jnp.float32)
    targets = jax.random.randint(k_t, (B,), 0, NUM_CLASSES, dtype=jnp.int32)

    loss = label_smoothing_cross_entropy(
        inputs, targets, smoothing=SMOOTHING, num_classes=NUM_CLASSES
    )
    loss = jax.block_until_ready(loss)

    ref = _reference(inputs, targets, SMOOTHING, NUM_CLASSES)
    assert jnp.allclose(loss, ref, rtol=1e-5, atol=1e-5), (loss, ref)
    print("KERNEL_OK")
</pallas_src>

<mosaic_0001>
module attributes {stable_mosaic.version = 11 : i64} {
  func.func @_ls_ce_kernel(%arg0: i32, %arg1: memref<8x128xf32, #tpu.memory_space<vmem>>, %arg2: memref<8x1xi32, #tpu.memory_space<vmem>>, %arg3: memref<8x1xf32, #tpu.memory_space<vmem>>) attributes {dimension_semantics = [#tpu.dimension_semantics<parallel>], iteration_bounds = array<i64: 1>, scalar_prefetch = 0 : i64, scratch_operands = 0 : i64, tpu.core_type = #tpu.core_type<tc>, window_params = [{transform_indices = @transform_0, window_bounds = array<i64: 8, 128>}, {transform_indices = @transform_1, window_bounds = array<i64: 8, 1>}, {transform_indices = @transform_2, window_bounds = array<i64: 8, 1>}]} {
    %c0 = arith.constant 0 : index
    %c0_0 = arith.constant 0 : index
    %0 = vector.load %arg1[%c0, %c0_0] : memref<8x128xf32, #tpu.memory_space<vmem>>, vector<8x128xf32>
    %c0_1 = arith.constant 0 : index
    %c0_2 = arith.constant 0 : index
    %1 = vector.load %arg2[%c0_1, %c0_2] : memref<8x1xi32, #tpu.memory_space<vmem>>, vector<8x1xi32>
    %2 = tpu.iota {dimensions = array<i32: 1>} : vector<8x128xi32>
    %c10_i32 = arith.constant 10 : i32
    %3 = vector.broadcast %c10_i32 : i32 to vector<8x128xi32>
    %4 = arith.cmpi slt, %2, %3 : vector<8x128xi32>
    %cst = arith.constant 0xFF800000 : f32
    %5 = vector.broadcast %cst : f32 to vector<8x128xf32>
    %6 = arith.select %4, %0, %5 : vector<8x128xi1>, vector<8x128xf32>
    %cst_3 = arith.constant dense<0xFF800000> : vector<8xf32>
    %7 = vector.multi_reduction <maximumf>, %6, %cst_3 [1] : vector<8x128xf32> to vector<8xf32>
    %8 = vector.shape_cast %7 : vector<8xf32> to vector<8x1xf32>
    %9 = vector.broadcast %8 : vector<8x1xf32> to vector<8x128xf32>
    %10 = arith.subf %6, %9 : vector<8x128xf32>
    %11 = math.exp %10 : vector<8x128xf32>
    %cst_4 = arith.constant dense<0.000000e+00> : vector<8xf32>
    %12 = vector.multi_reduction <add>, %11, %cst_4 [1] : vector<8x128xf32> to vector<8xf32>
    %13 = vector.shape_cast %12 : vector<8xf32> to vector<8x1xf32>
    %14 = math.log %13 : vector<8x1xf32>
    %15 = arith.addf %14, %8 : vector<8x1xf32>
    %16 = vector.broadcast %1 : vector<8x1xi32> to vector<8x128xi32>
    %17 = arith.cmpi eq, %2, %16 : vector<8x128xi32>
    %cst_5 = arith.constant 0.000000e+00 : f32
    %18 = vector.broadcast %cst_5 : f32 to vector<8x128xf32>
    %19 = arith.select %17, %0, %18 : vector<8x128xi1>, vector<8x128xf32>
    %cst_6 = arith.constant dense<0.000000e+00> : vector<8xf32>
    %20 = vector.multi_reduction <add>, %19, %cst_6 [1] : vector<8x128xf32> to vector<8xf32>
    %21 = vector.shape_cast %20 : vector<8xf32> to vector<8x1xf32>
    %cst_7 = arith.constant 0.000000e+00 : f32
    %22 = vector.broadcast %cst_7 : f32 to vector<8x128xf32>
    %23 = arith.select %4, %0, %22 : vector<8x128xi1>, vector<8x128xf32>
    %cst_8 = arith.constant dense<0.000000e+00> : vector<8xf32>
    %24 = vector.multi_reduction <add>, %23, %cst_8 [1] : vector<8x128xf32> to vector<8xf32>
    %25 = vector.shape_cast %24 : vector<8xf32> to vector<8x1xf32>
    %26 = arith.subf %21, %15 : vector<8x1xf32>
    %cst_9 = arith.constant 0.888888895 : f32
    %27 = vector.broadcast %cst_9 : f32 to vector<8x1xf32>
    %28 = arith.mulf %27, %26 : vector<8x1xf32>
    %cst_10 = arith.constant 1.000000e+01 : f32
    %29 = vector.broadcast %cst_10 : f32 to vector<8x1xf32>
    %30 = arith.mulf %29, %15 : vector<8x1xf32>
    %31 = arith.subf %25, %30 : vector<8x1xf32>
    %cst_11 = arith.constant 0.0111111114 : f32
    %32 = vector.broadcast %cst_11 : f32 to vector<8x1xf32>
    %33 = arith.mulf %32, %31 : vector<8x1xf32>
    %34 = arith.addf %28, %33 : vector<8x1xf32>
    %cst_12 = arith.constant 0.000000e+00 : f32
    %35 = vector.broadcast %cst_12 : f32 to vector<8x1xf32>
    %36 = arith.subf %35, %34 : vector<8x1xf32>
    %c8_i32 = arith.constant 8 : i32
    %37 = arith.muli %arg0, %c8_i32 : i32
    %38 = tpu.iota {dimensions = array<i32: 0>} : vector<8x1xi32>
    %39 = vector.broadcast %37 : i32 to vector<8x1xi32>
    %40 = arith.addi %39, %38 : vector<8x1xi32>
    %c8_i32_13 = arith.constant 8 : i32
    %41 = vector.broadcast %c8_i32_13 : i32 to vector<8x1xi32>
    %42 = arith.cmpi slt, %40, %41 : vector<8x1xi32>
    %cst_14 = arith.constant 0.000000e+00 : f32
    %43 = vector.broadcast %cst_14 : f32 to vector<8x1xf32>
    %44 = arith.select %42, %36, %43 : vector<8x1xi1>, vector<8x1xf32>
    %c0_15 = arith.constant 0 : index
    %c0_16 = arith.constant 0 : index
    %45 = vector.load %arg3[%c0_15, %c0_16] : memref<8x1xf32, #tpu.memory_space<vmem>>, vector<8x1xf32>
    tpu.vector_store %arg3[%c0_15, %c0_16], %44 {strides = array<i32>} : memref<8x1xf32, #tpu.memory_space<vmem>>, vector<8x1xf32>,
    return
  }
  func.func @transform_0(%arg0: i32) -> (i32, i32) {
    %c0_i32 = arith.constant 0 : i32
    %c0_i32_0 = arith.constant 0 : i32
    return %arg0, %c0_i32 : i32, i32
  }
  func.func @transform_1(%arg0: i32) -> (i32, i32) {
    %c0_i32 = arith.constant 0 : i32
    %c0_i32_0 = arith.constant 0 : i32
    return %arg0, %c0_i32 : i32, i32
  }
  func.func @transform_2(%arg0: i32) -> (i32, i32) {
    %c0_i32 = arith.constant 0 : i32
    %c0_i32_0 = arith.constant 0 : i32
    return %arg0, %c0_i32 : i32, i32
  }
}

</mosaic_0001>

<bundles_post_ra>
// kernel: tpu_custom_call.1
= control target key start
LH: loop header
LB: loop body
LE: loop exit
PB: predicated region body
PF: predicated region fallthrough
CT: control target
= control target key end

     0   :  { %v13_v0 = vlaneseq  ;;  %v63_v1 = vmov 0   ;;  %vm51_vm2 = vcmask 7168   ;;  %s90_s0 = inlined_call_operand.vmem [shape: f32[8,128], index: 0, kind: input, shape index: {}]   ;;  %s91_s1 = inlined_call_operand.vmem [shape: s32[8,1], index: 1, kind: input, shape index: {}]   ;;  %s92_s2 = inlined_call_operand.vmem [shape: f32[8,1], index: 2, kind: output, shape index: {}]  }
   0x1   :  { %58 = vset.pattern.permute.xlu0 %v63_v1  ;;  %v11_v2 = vld [vmem:[%s90_s0] sm:$0xff] }
   0x2   :  { %v14_v3 = vand.u32 127, %v13_v0  ;;  %v12_v5 = vld [vmem:[%s91_s1] sm:$0xff] }
   0x4   :  { %vm15_vm0 = vcmp.lt.s32.totalorder %v14_v3, 10 }
   0x5   :  { %v16_v4 = vsel %vm15_vm0, %v11_v2, -inf  ;;  %v34_v12 = vsel %vm15_vm0, %v11_v2, 0.0 }
   0x6   :  { %17 = vmax.xlane.f32.xlu0 %v16_v4 }
  0x1c   :  { %28 = vperm.xlu0 %58, %v12_v5  }
  0x93   :  { %v18_v6 = vpop.xlane.xlu0 %17 }
  0x94   :  { %v19_v7 = vsub.f32 %v16_v4, %v18_v6 }
  0x96   :  { %v20_v8 = vmul.f32 1.442695, %v19_v7 }
  0x98   :  { %59 = vpow2.f32 %v20_v8 }
  0x9b   :  { %v29_v9 = vpop.permute.xlu0 %28 }
  0x9c   :  { %vm30_vm1 = vcmp.eq.s32.totalorder %v14_v3, %v29_v9 }
  0x9d   :  { %v31_v11 = vsel %vm30_vm1, %v11_v2, 0.0 }
  0xa2   :  { %v60_v10 = vpop.eup %59 }
  0xa3   :  { %22 = vadd.xlane.f32.xlu1 %v60_v10 }
  0xa7   :  { %32 = vadd.xlane.f32.xlu1 %v31_v11 }
  0xab   :  { %35 = vadd.xlane.f32.xlu1 %v34_v12 }
 0x130   :  { %v23_v13 = vpop.xlane.xlu1 %22 }
 0x131   :  { %61 = vlog2.f32 %v23_v13 }
 0x134   :  { %v33_v14 = vpop.xlane.xlu1 %32 }
 0x138   :  { %v36_v18 = vpop.xlane.xlu1 %35 }
 0x13b   :  { %v62_v15 = vpop.eup %61 }
 0x13c   :  { %v25_v16 = vmul.f32 0.6931472, %v62_v15 }
 0x13e   :  { %v26_v17 = vadd.f32 %v25_v16, %v18_v6 }
 0x140   :  { %v37_v19 = vsub.f32 %v33_v14, %v26_v17  ;;  %v39_v20 = vmul.f32 10.0, %v26_v17 }
 0x142   :  { %v40_v21 = vsub.f32 %v36_v18, %v39_v20  ;;  %v38_v22 = vmul.f32 0.8888889, %v37_v19 }
 0x144   :  { %v41_v23 = vmul.f32 0.011111111, %v40_v21 }
 0x146   :  { %v42_v24 = vadd.f32 %v41_v23, %v38_v22 }
 0x148   :  { %v43_v25 = vsub.f32 0.0, %v42_v24 }
 0x14a   :  { %52 = vst.msk [vmem:[%s92_s2] sm:$0xff] %vm51_vm2, %v43_v25 }

</bundles_post_ra>
